<compile_context>
chip_gen: v5e
topology: v5e:2x2
jax: 0.10.0
libtpu: 0.0.40
codegen_flags: <defaults>
</compile_context>

<pallas_src>
import functools

import jax
import jax.numpy as jnp
from jax.experimental import pallas as pl
from jax.experimental.pallas import tpu as pltpu


ATOM_PAD = 128  # each action's atom block is padded to one full lane group


def _round_up(v, m):
    return (v + m - 1) // m * m


def c51_kernel(x_ref, w1_ref, b1_ref, w2_ref, b2_ref, w3_ref, b3_ref,
               out_ref, *, n_actions, atom_pad):
    """fc1 -> relu -> fc2 -> relu -> fc3(padded) -> per-action softmax."""
    # x arrives already in bf16; matmuls accumulate in f32, elementwise in f32.
    x = x_ref[...]

    h1 = jnp.dot(x, w1_ref[...], preferred_element_type=jnp.float32) + b1_ref[...]
    h1 = jnp.maximum(h1, 0.0)

    h2 = jnp.dot(h1.astype(jnp.bfloat16), w2_ref[...],
                 preferred_element_type=jnp.float32) + b2_ref[...]
    h2 = jnp.maximum(h2, 0.0)

    logits = jnp.dot(h2.astype(jnp.bfloat16), w3_ref[...],
                     preferred_element_type=jnp.float32) + b3_ref[...]
    # logits: (tb, n_actions * atom_pad); each action block is 128-lane aligned.
    # Padded columns have weight 0 and bias -1e30 -> exp underflows to exactly
    # 0, so the softmax over the real atoms is unchanged.

    for a in range(n_actions):  # small, static loop; all slices are aligned views
        la = logits[:, a * atom_pad:(a + 1) * atom_pad]          # (tb, 128)
        m = jnp.max(la, axis=-1, keepdims=True)
        e = jnp.exp(la - m)
        denom = jnp.sum(e, axis=-1, keepdims=True)
        p = e * (1.0 / denom)                                    # exact normalize
        # Direct aligned 128-lane store into the output slab (no concatenate).
        out_ref[:, a * atom_pad:(a + 1) * atom_pad] = p.astype(out_ref.dtype)


def distributional_network_forward(x, kernel_params, n_actions, n_atoms,
                                   block_b=1024):
    """Pallas forward. x: (B, n_states) float32 -> (B, n_actions, n_atoms) f32."""
    w1, b1, w2, b2, w3p, b3p = kernel_params
    B, n_states = x.shape
    hidden = w1.shape[1]
    out_cols = n_actions * ATOM_PAD

    # Activations in bf16 on the wire; matmul accumulation stays f32 in-kernel.
    x = x.astype(jnp.bfloat16)

    # Batch tiling: multiples of 16 rows (native bf16 sublane tile) and at
    # least 2 grid steps so the "parallel" axis can use both v7x TensorCores.
    tb = min(block_b, max(16, _round_up((B + 1) // 2, 16)))
    b_pad = _round_up(B, tb)
    if b_pad // tb < 2:
        b_pad = 2 * tb
    if b_pad != B:
        x = jnp.pad(x, ((0, b_pad - B), (0, 0)))
    grid = (b_pad // tb,)

    kernel = functools.partial(c51_kernel, n_actions=n_actions,
                               atom_pad=ATOM_PAD)

    out = pl.pallas_call(
        kernel,
        out_shape=jax.ShapeDtypeStruct((b_pad, out_cols), jnp.bfloat16),
        grid=grid,
        in_specs=[
            pl.BlockSpec((tb, n_states), lambda i: (i, 0)),       # x: tiles over B
            pl.BlockSpec((n_states, hidden), lambda i: (0, 0)),   # weights stay
            pl.BlockSpec((1, hidden), lambda i: (0, 0)),          #   VMEM-resident
            pl.BlockSpec((hidden, hidden), lambda i: (0, 0)),
            pl.BlockSpec((1, hidden), lambda i: (0, 0)),
            pl.BlockSpec((hidden, out_cols), lambda i: (0, 0)),
            pl.BlockSpec((1, out_cols), lambda i: (0, 0)),
        ],
        out_specs=pl.BlockSpec((tb, out_cols), lambda i: (i, 0)),
        compiler_params=pltpu.CompilerParams(
            dimension_semantics=("parallel",),
            vmem_limit_bytes=48 * 1024 * 1024),
    )(x, w1, b1, w2, b2, w3p, b3p)

    # Padded bf16 slab -> compact (B, n_actions, n_atoms) f32. The slab is
    # already half-width (bf16), so this compaction pass is cheap.
    out = out[:B].reshape(B, n_actions, ATOM_PAD)[:, :, :n_atoms]
    return out.astype(jnp.float32)


def init_params(key, n_states, n_actions, n_atoms, hidden=128):
    """Deterministic PyTorch-Linear-style uniform init; weights stored (in, out), f32."""
    def linear_init(k, fan_in, fan_out):
        kw, kb = jax.random.split(k)
        bound = 1.0 / jnp.sqrt(fan_in)
        w = jax.random.uniform(kw, (fan_in, fan_out), jnp.float32, -bound, bound)
        b = jax.random.uniform(kb, (1, fan_out), jnp.float32, -bound, bound)
        return w, b

    k1, k2, k3 = jax.random.split(key, 3)
    w1, b1 = linear_init(k1, n_states, hidden)
    w2, b2 = linear_init(k2, hidden, hidden)
    w3, b3 = linear_init(k3, hidden, n_actions * n_atoms)
    return (w1, b1, w2, b2, w3, b3)


def prepare_kernel_params(params_f32, n_actions, n_atoms, atom_pad=ATOM_PAD):
    """Convert f32 (in,out) params to the kernel layout:
       bf16 weights, f32 biases, fc3 atom-padded to 128 columns per action."""
    w1, b1, w2, b2, w3, b3 = params_f32
    hidden = w1.shape[1]

    w3r = w3.reshape(hidden, n_actions, n_atoms)
    b3r = b3.reshape(1, n_actions, n_atoms)
    w3p = jnp.zeros((hidden, n_actions, atom_pad), jnp.float32)
    w3p = w3p.at[:, :, :n_atoms].set(w3r).reshape(hidden, n_actions * atom_pad)
    # Pad bias with a large finite negative (not -inf) so exp() is exactly 0
    # and no inf-inf NaNs appear.
    b3p = jnp.full((1, n_actions, atom_pad), -1e30, jnp.float32)
    b3p = b3p.at[:, :, :n_atoms].set(b3r).reshape(1, n_actions * atom_pad)

    return (w1.astype(jnp.bfloat16), b1,
            w2.astype(jnp.bfloat16), b2,
            w3p.astype(jnp.bfloat16), b3p)


def reference_forward(x, params_f32, n_actions, n_atoms):
    """Pure-JAX reference matching the kernel numerics (bf16 matmul inputs, f32 acc)."""
    w1, b1, w2, b2, w3, b3 = params_f32
    h = jnp.dot(x.astype(jnp.bfloat16), w1.astype(jnp.bfloat16),
                preferred_element_type=jnp.float32) + b1
    h = jnp.maximum(h, 0.0)
    h = jnp.dot(h.astype(jnp.bfloat16), w2.astype(jnp.bfloat16),
                preferred_element_type=jnp.float32) + b2
    h = jnp.maximum(h, 0.0)
    logits = jnp.dot(h.astype(jnp.bfloat16), w3.astype(jnp.bfloat16),
                     preferred_element_type=jnp.float32) + b3
    logits = logits.reshape(-1, n_actions, n_atoms)
    return jax.nn.softmax(logits, axis=-1)


if __name__ == "__main__":
    # Module hyper-parameters (C51-style):
    n_states, n_actions, n_atoms = 8, 4, 51
    Vmin, Vmax = 0.0, 200.0
    delta_z = (Vmax - Vmin) / (n_atoms - 1)
    supports = jnp.arange(Vmin, Vmax + delta_z, delta_z)  # buffer, unused in forward

    batch = 2
    key = jax.random.PRNGKey(0)
    k_params, k_x = jax.random.split(key)

    params = init_params(k_params, n_states, n_actions, n_atoms)
    kparams = prepare_kernel_params(params, n_actions, n_atoms)
    x = jax.random.normal(k_x, (batch, n_states), jnp.float32)

    out = distributional_network_forward(x, kparams, n_actions, n_atoms)
    out = jax.block_until_ready(out)

    # Sanity-check against the numerics-matched pure-JAX reference.
    ref = reference_forward(x, params, n_actions, n_atoms)
    assert out.shape == (batch, n_actions, n_atoms)
    # Tolerances cover the bf16 output quantization (rel. error <= 2^-9).
    assert jnp.allclose(out, ref, atol=5e-3, rtol=2e-2)
    # Exact divide in the kernel: per-action sums deviate from 1 only by the
    # bf16 output rounding (<= ~0.2%).
    assert jnp.allclose(jnp.sum(out, axis=-1), 1.0, atol=5e-3)

    print("KERNEL_OK")
</pallas_src>

<mosaic_0001>
module attributes {stable_mosaic.version = 11 : i64} {
  func.func @c51_kernel(%arg0: i32, %arg1: memref<16x8xbf16, #tpu.memory_space<vmem>>, %arg2: memref<8x128xbf16, #tpu.memory_space<vmem>>, %arg3: memref<1x128xf32, #tpu.memory_space<vmem>>, %arg4: memref<128x128xbf16, #tpu.memory_space<vmem>>, %arg5: memref<1x128xf32, #tpu.memory_space<vmem>>, %arg6: memref<128x512xbf16, #tpu.memory_space<vmem>>, %arg7: memref<1x512xf32, #tpu.memory_space<vmem>>, %arg8: memref<16x512xbf16, #tpu.memory_space<vmem>>) attributes {dimension_semantics = [#tpu.dimension_semantics<parallel>], iteration_bounds = array<i64: 2>, scalar_prefetch = 0 : i64, scratch_operands = 0 : i64, tpu.core_type = #tpu.core_type<tc>, window_params = [{transform_indices = @transform_0, window_bounds = array<i64: 16, 8>}, {pipeline_mode = #tpu.pipeline_mode<synchronous>, transform_indices = @transform_1, window_bounds = array<i64: 8, 128>}, {pipeline_mode = #tpu.pipeline_mode<synchronous>, transform_indices = @transform_2, window_bounds = array<i64: 1, 128>}, {pipeline_mode = #tpu.pipeline_mode<synchronous>, transform_indices = @transform_3, window_bounds = array<i64: 128, 128>}, {pipeline_mode = #tpu.pipeline_mode<synchronous>, transform_indices = @transform_4, window_bounds = array<i64: 1, 128>}, {pipeline_mode = #tpu.pipeline_mode<synchronous>, transform_indices = @transform_5, window_bounds = array<i64: 128, 512>}, {pipeline_mode = #tpu.pipeline_mode<synchronous>, transform_indices = @transform_6, window_bounds = array<i64: 1, 512>}, {transform_indices = @transform_7, window_bounds = array<i64: 16, 512>}]} {
    %c0 = arith.constant 0 : index
    %c0_0 = arith.constant 0 : index
    %0 = vector.load %arg1[%c0, %c0_0] : memref<16x8xbf16, #tpu.memory_space<vmem>>, vector<16x8xbf16>
    %c0_1 = arith.constant 0 : index
    %c0_2 = arith.constant 0 : index
    %1 = vector.load %arg2[%c0_1, %c0_2] : memref<8x128xbf16, #tpu.memory_space<vmem>>, vector<8x128xbf16>
    %cst = arith.constant dense<0.000000e+00> : vector<16x128xf32>
    %2 = tpu.matmul %0, %1, %cst {dimension_numbers = #tpu.dot_dimension_numbers<[1], [0], [0], [1], [0, 0, 1, 1], [], []>} : vector<16x8xbf16>, vector<8x128xbf16>, vector<16x128xf32> -> vector<16x128xf32>
    %c0_3 = arith.constant 0 : index
    %c0_4 = arith.constant 0 : index
    %3 = vector.load %arg3[%c0_3, %c0_4] : memref<1x128xf32, #tpu.memory_space<vmem>>, vector<1x128xf32>
    %4 = vector.broadcast %3 : vector<1x128xf32> to vector<16x128xf32>
    %5 = arith.addf %2, %4 : vector<16x128xf32>
    %cst_5 = arith.constant 0.000000e+00 : f32
    %6 = vector.broadcast %cst_5 : f32 to vector<16x128xf32>
    %7 = arith.maximumf %5, %6 : vector<16x128xf32>
    %8 = arith.truncf %7 : vector<16x128xf32> to vector<16x128xbf16>
    %c0_6 = arith.constant 0 : index
    %c0_7 = arith.constant 0 : index
    %9 = vector.load %arg4[%c0_6, %c0_7] : memref<128x128xbf16, #tpu.memory_space<vmem>>, vector<128x128xbf16>
    %cst_8 = arith.constant dense<0.000000e+00> : vector<16x128xf32>
    %10 = tpu.matmul %8, %9, %cst_8 {dimension_numbers = #tpu.dot_dimension_numbers<[1], [0], [0], [1], [0, 0, 1, 1], [], []>} : vector<16x128xbf16>, vector<128x128xbf16>, vector<16x128xf32> -> vector<16x128xf32>
    %c0_9 = arith.constant 0 : index
    %c0_10 = arith.constant 0 : index
    %11 = vector.load %arg5[%c0_9, %c0_10] : memref<1x128xf32, #tpu.memory_space<vmem>>, vector<1x128xf32>
    %12 = vector.broadcast %11 : vector<1x128xf32> to vector<16x128xf32>
    %13 = arith.addf %10, %12 : vector<16x128xf32>
    %cst_11 = arith.constant 0.000000e+00 : f32
    %14 = vector.broadcast %cst_11 : f32 to vector<16x128xf32>
    %15 = arith.maximumf %13, %14 : vector<16x128xf32>
    %16 = arith.truncf %15 : vector<16x128xf32> to vector<16x128xbf16>
    %c0_12 = arith.constant 0 : index
    %c0_13 = arith.constant 0 : index
    %17 = vector.load %arg6[%c0_12, %c0_13] : memref<128x512xbf16, #tpu.memory_space<vmem>>, vector<128x512xbf16>
    %cst_14 = arith.constant dense<0.000000e+00> : vector<16x512xf32>
    %18 = tpu.matmul %16, %17, %cst_14 {dimension_numbers = #tpu.dot_dimension_numbers<[1], [0], [0], [1], [0, 0, 1, 1], [], []>} : vector<16x128xbf16>, vector<128x512xbf16>, vector<16x512xf32> -> vector<16x512xf32>
    %c0_15 = arith.constant 0 : index
    %c0_16 = arith.constant 0 : index
    %19 = vector.load %arg7[%c0_15, %c0_16] : memref<1x512xf32, #tpu.memory_space<vmem>>, vector<1x512xf32>
    %20 = vector.broadcast %19 : vector<1x512xf32> to vector<16x512xf32>
    %21 = arith.addf %18, %20 : vector<16x512xf32>
    %22 = vector.extract_strided_slice %21 {offsets = [0, 0], sizes = [16, 128], strides = [1, 1]} : vector<16x512xf32> to vector<16x128xf32>
    %cst_17 = arith.constant dense<0xFF800000> : vector<16xf32>
    %23 = vector.multi_reduction <maximumf>, %22, %cst_17 [1] : vector<16x128xf32> to vector<16xf32>
    %24 = vector.shape_cast %23 : vector<16xf32> to vector<16x1xf32>
    %25 = vector.broadcast %24 : vector<16x1xf32> to vector<16x128xf32>
    %26 = arith.subf %22, %25 : vector<16x128xf32>
    %27 = math.exp %26 : vector<16x128xf32>
    %cst_18 = arith.constant dense<0.000000e+00> : vector<16xf32>
    %28 = vector.multi_reduction <add>, %27, %cst_18 [1] : vector<16x128xf32> to vector<16xf32>
    %29 = vector.shape_cast %28 : vector<16xf32> to vector<16x1xf32>
    %cst_19 = arith.constant 1.000000e+00 : f32
    %30 = vector.broadcast %cst_19 : f32 to vector<16x1xf32>
    %31 = arith.divf %30, %29 : vector<16x1xf32>
    %32 = vector.broadcast %31 : vector<16x1xf32> to vector<16x128xf32>
    %33 = arith.mulf %27, %32 : vector<16x128xf32>
    %34 = arith.truncf %33 : vector<16x128xf32> to vector<16x128xbf16>
    %c0_20 = arith.constant 0 : index
    %c0_21 = arith.constant 0 : index
    %35 = vector.load %arg8[%c0_20, %c0_21] : memref<16x512xbf16, #tpu.memory_space<vmem>>, vector<16x128xbf16>
    tpu.vector_store %arg8[%c0_20, %c0_21], %34 {strides = array<i32>} : memref<16x512xbf16, #tpu.memory_space<vmem>>, vector<16x128xbf16>,
    %36 = vector.extract_strided_slice %21 {offsets = [0, 128], sizes = [16, 128], strides = [1, 1]} : vector<16x512xf32> to vector<16x128xf32>
    %cst_22 = arith.constant dense<0xFF800000> : vector<16xf32>
    %37 = vector.multi_reduction <maximumf>, %36, %cst_22 [1] : vector<16x128xf32> to vector<16xf32>
    %38 = vector.shape_cast %37 : vector<16xf32> to vector<16x1xf32>
    %39 = vector.broadcast %38 : vector<16x1xf32> to vector<16x128xf32>
    %40 = arith.subf %36, %39 : vector<16x128xf32>
    %41 = math.exp %40 : vector<16x128xf32>
    %cst_23 = arith.constant dense<0.000000e+00> : vector<16xf32>
    %42 = vector.multi_reduction <add>, %41, %cst_23 [1] : vector<16x128xf32> to vector<16xf32>
    %43 = vector.shape_cast %42 : vector<16xf32> to vector<16x1xf32>
    %cst_24 = arith.constant 1.000000e+00 : f32
    %44 = vector.broadcast %cst_24 : f32 to vector<16x1xf32>
    %45 = arith.divf %44, %43 : vector<16x1xf32>
    %46 = vector.broadcast %45 : vector<16x1xf32> to vector<16x128xf32>
    %47 = arith.mulf %41, %46 : vector<16x128xf32>
    %48 = arith.truncf %47 : vector<16x128xf32> to vector<16x128xbf16>
    %c0_25 = arith.constant 0 : index
    %c128 = arith.constant 128 : index
    %49 = vector.load %arg8[%c0_25, %c128] : memref<16x512xbf16, #tpu.memory_space<vmem>>, vector<16x128xbf16>
    tpu.vector_store %arg8[%c0_25, %c128], %48 {strides = array<i32>} : memref<16x512xbf16, #tpu.memory_space<vmem>>, vector<16x128xbf16>,
    %50 = vector.extract_strided_slice %21 {offsets = [0, 256], sizes = [16, 128], strides = [1, 1]} : vector<16x512xf32> to vector<16x128xf32>
    %cst_26 = arith.constant dense<0xFF800000> : vector<16xf32>
    %51 = vector.multi_reduction <maximumf>, %50, %cst_26 [1] : vector<16x128xf32> to vector<16xf32>
    %52 = vector.shape_cast %51 : vector<16xf32> to vector<16x1xf32>
    %53 = vector.broadcast %52 : vector<16x1xf32> to vector<16x128xf32>
    %54 = arith.subf %50, %53 : vector<16x128xf32>
    %55 = math.exp %54 : vector<16x128xf32>
    %cst_27 = arith.constant dense<0.000000e+00> : vector<16xf32>
    %56 = vector.multi_reduction <add>, %55, %cst_27 [1] : vector<16x128xf32> to vector<16xf32>
    %57 = vector.shape_cast %56 : vector<16xf32> to vector<16x1xf32>
    %cst_28 = arith.constant 1.000000e+00 : f32
    %58 = vector.broadcast %cst_28 : f32 to vector<16x1xf32>
    %59 = arith.divf %58, %57 : vector<16x1xf32>
    %60 = vector.broadcast %59 : vector<16x1xf32> to vector<16x128xf32>
    %61 = arith.mulf %55, %60 : vector<16x128xf32>
    %62 = arith.truncf %61 : vector<16x128xf32> to vector<16x128xbf16>
    %c0_29 = arith.constant 0 : index
    %c256 = arith.constant 256 : index
    %63 = vector.load %arg8[%c0_29, %c256] : memref<16x512xbf16, #tpu.memory_space<vmem>>, vector<16x128xbf16>
    tpu.vector_store %arg8[%c0_29, %c256], %62 {strides = array<i32>} : memref<16x512xbf16, #tpu.memory_space<vmem>>, vector<16x128xbf16>,
    %64 = vector.extract_strided_slice %21 {offsets = [0, 384], sizes = [16, 128], strides = [1, 1]} : vector<16x512xf32> to vector<16x128xf32>
    %cst_30 = arith.constant dense<0xFF800000> : vector<16xf32>
    %65 = vector.multi_reduction <maximumf>, %64, %cst_30 [1] : vector<16x128xf32> to vector<16xf32>
    %66 = vector.shape_cast %65 : vector<16xf32> to vector<16x1xf32>
    %67 = vector.broadcast %66 : vector<16x1xf32> to vector<16x128xf32>
    %68 = arith.subf %64, %67 : vector<16x128xf32>
    %69 = math.exp %68 : vector<16x128xf32>
    %cst_31 = arith.constant dense<0.000000e+00> : vector<16xf32>
    %70 = vector.multi_reduction <add>, %69, %cst_31 [1] : vector<16x128xf32> to vector<16xf32>
    %71 = vector.shape_cast %70 : vector<16xf32> to vector<16x1xf32>
    %cst_32 = arith.constant 1.000000e+00 : f32
    %72 = vector.broadcast %cst_32 : f32 to vector<16x1xf32>
    %73 = arith.divf %72, %71 : vector<16x1xf32>
    %74 = vector.broadcast %73 : vector<16x1xf32> to vector<16x128xf32>
    %75 = arith.mulf %69, %74 : vector<16x128xf32>
    %76 = arith.truncf %75 : vector<16x128xf32> to vector<16x128xbf16>
    %c0_33 = arith.constant 0 : index
    %c384 = arith.constant 384 : index
    %77 = vector.load %arg8[%c0_33, %c384] : memref<16x512xbf16, #tpu.memory_space<vmem>>, vector<16x128xbf16>
    tpu.vector_store %arg8[%c0_33, %c384], %76 {strides = array<i32>} : memref<16x512xbf16, #tpu.memory_space<vmem>>, vector<16x128xbf16>,
    return
  }
  func.func @transform_0(%arg0: i32) -> (i32, i32) {
    %c0_i32 = arith.constant 0 : i32
    %c0_i32_0 = arith.constant 0 : i32
    return %arg0, %c0_i32 : i32, i32
  }
  func.func @transform_1(%arg0: i32) -> (i32, i32) {
    %c0_i32 = arith.constant 0 : i32
    %c0_i32_0 = arith.constant 0 : i32
    %c0_i32_1 = arith.constant 0 : i32
    return %c0_i32, %c0_i32_0 : i32, i32
  }
  func.func @transform_2(%arg0: i32) -> (i32, i32) {
    %c0_i32 = arith.constant 0 : i32
    %c0_i32_0 = arith.constant 0 : i32
    %c0_i32_1 = arith.constant 0 : i32
    return %c0_i32, %c0_i32_0 : i32, i32
  }
  func.func @transform_3(%arg0: i32) -> (i32, i32) {
    %c0_i32 = arith.constant 0 : i32
    %c0_i32_0 = arith.constant 0 : i32
    %c0_i32_1 = arith.constant 0 : i32
    return %c0_i32, %c0_i32_0 : i32, i32
  }
  func.func @transform_4(%arg0: i32) -> (i32, i32) {
    %c0_i32 = arith.constant 0 : i32
    %c0_i32_0 = arith.constant 0 : i32
    %c0_i32_1 = arith.constant 0 : i32
    return %c0_i32, %c0_i32_0 : i32, i32
  }
  func.func @transform_5(%arg0: i32) -> (i32, i32) {
    %c0_i32 = arith.constant 0 : i32
    %c0_i32_0 = arith.constant 0 : i32
    %c0_i32_1 = arith.constant 0 : i32
    return %c0_i32, %c0_i32_0 : i32, i32
  }
  func.func @transform_6(%arg0: i32) -> (i32, i32) {
    %c0_i32 = arith.constant 0 : i32
    %c0_i32_0 = arith.constant 0 : i32
    %c0_i32_1 = arith.constant 0 : i32
    return %c0_i32, %c0_i32_0 : i32, i32
  }
  func.func @transform_7(%arg0: i32) -> (i32, i32) {
    %c0_i32 = arith.constant 0 : i32
    %c0_i32_0 = arith.constant 0 : i32
    return %arg0, %c0_i32 : i32, i32
  }
}

</mosaic_0001>

<bundles_post_ra>
// kernel: tpu_custom_call.1
= control target key start
LH: loop header
LB: loop body
LE: loop exit
PB: predicated region body
PF: predicated region fallthrough
CT: control target
= control target key end

     0   :  { %12 = vsyncpa [#allocation3], 0  ;;  %s1706_s0 = inlined_call_operand.vmem [shape: bf16[32,8], index: 0, kind: input, shape index: {}]   ;;  %s1707_s1 = inlined_call_operand.vmem [shape: bf16[8,128], index: 1, kind: input, shape index: {}]   ;;  %s1708_s2 = inlined_call_operand.vmem [shape: f32[1,128], index: 2, kind: input, shape index: {}]   ;;  %s1709_s3 = inlined_call_operand.hbm [shape: bf16[128,128], index: 3, kind: input, shape index: {}]   ;;  %s1710_s4 = inlined_call_operand.vmem [shape: f32[1,128], index: 4, kind: input, shape index: {}]   ;;  %s1711_s5 = inlined_call_operand.hbm [shape: bf16[128,512], index: 5, kind: input, shape index: {}]   ;;  %s1712_s6 = inlined_call_operand.vmem [shape: f32[1,512], index: 6, kind: input, shape index: {}]   ;;  %s1713_s7 = inlined_call_operand.hbm [shape: bf16[32,512], index: 7, kind: output, shape index: {}]  }
   0x1   :  { %13 = vsyncpa [#allocation6], 0 }
   0x2   :  { %14 = vsyncpa [#allocation4], 0 }
   0x3   :  { %16 = vsyncpa [#allocation4 + $0x1], 0  ;;  %s1501_s24 = smov 0   ;;  %s1503_s25 = smov 0  }
   0x4   :  { %s1505_s26 = smov 0   ;;  %s1507_s27 = smov 0  }
   0x5 LB: > { %s1522_s28 = sadd.s32 4294967295, %s1451_s27   ;;  %s996_s29 = sadd.s32 4294967294, %s1451_s27   ;;  %s1451_s27 = sphi %s1507_s27, %s1720_s27   ;;  %s1447_s26 = sphi %s1505_s26, %s1719_s26   ;;  %s1443_s25 = sphi %s1503_s25, %s1718_s25   ;;  %s1439_s24 = sphi %s1501_s24, %s1717_s24  }
   0x6   : > { %s1526_s30 = sadd.s32 1, %s1451_s27   ;;  %s181_s8 = sadd.s32 1, %s1447_s26 }
   0x7   : > { %s178_s9 = ssub.s32 %s1451_s27, %s1526_s30  ;;  %p191_p0 = scmp.ne.s32.totalorder %s1447_s26, %s1443_s25 }
   0x8   : > { %p179_p1 = scmp.eq.s32.totalorder %s178_s9, 0  ;;  %p192_p2 = scmp.eq.s32.totalorder %s1522_s28, 1 }
   0x9   : > { %p197_p3 = scmp.ne.s32.totalorder %s1443_s25, %s1439_s24  ;;  %p198_p4 = scmp.eq.s32.totalorder %s996_s29, 1 }
   0xa   : > { %s1537_s10 = scalar_select %p179_p1, %s1447_s26, %s181_s8  }
   0xb   : > { %p1539_p5 = por %p192_p2, %p191_p0  ;;  %p1543_p6 = por %p198_p4, %p197_p3 }
   0xc   : > { %p997_p7 = scmp.ge.s32.totalorder %s1451_s27, 1  ;;  %p205_p8 = scmp.lt.s32.totalorder %s1451_s27, 3 }
   0xd   : > { %p1242_p9 = scmp.eq.s32.totalorder %s1522_s28, 0  ;;  %s222_s16 = sshll.u32 %s1709_s3, 4  ;;  %s223_s16 = int_to_ptr.hbm [resolvable:$true] %s222_s16 }
   0xe   : > { %p1550_p10 = pnand %p997_p7, %p205_p8  ;;  %s1453_s17 = smov [#allocation2]  }
   0xf   : > { %s224_s18 = sshll.u32 %s1453_s17, 4  ;;  %s239_s21 = sshll.u32 %s1711_s5, 4  ;;  %s225_s18 = int_to_ptr.vmem [resolvable:$true] %s224_s18  ;;  %s240_s21 = int_to_ptr.hbm [resolvable:$true] %s239_s21 }
  0x10   : > { %p1231_p11 = pneg %p1550_p10  ;;  %s1454_s22 = smov 64  }
  0x11   : > { %s1455_s23 = smov 4   ;;  %s1456_s29 = smov [#allocation5]  }
  0x12   : > { %p1232_p12 = pnand %p1242_p9, %p1231_p11  ;;  %s241_s8 = sshll.u32 %s1456_s29, 4  ;;  %s242_s8 = int_to_ptr.vmem [resolvable:$true] %s241_s8 }
  0x13   : > { %s1457_s9 = smov 256   ;;  %s1458_s14 = smov 16  }
  0x14   : > { %1234 = dma.hbm_to_vmem [thread:$0]  (!%p1232_p12), %s223_s16, 1024, %s225_s18, [#allocation3], %s1454_s22, %s1454_s22, %s1455_s23  }
  0x15   : > { %1237 = dma.hbm_to_vmem [thread:$0]  (!%p1232_p12), %s240_s21, 4096, %s242_s8, [#allocation6], %s1457_s9, %s1457_s9, %s1458_s14  }
  0x16   : > { %269 = sbr.rel (%p1550_p10) target bundleno = 737 (0x2e1), region = 48 }
  0x1b   : > { %1426 = dma.done.wait (%p1242_p9), [#allocation3], 1024  }
  0x1c   : > { %1428 = vsyncadd (%p1242_p9), [#allocation3], 4294966272 }
  0x1d   : > { %1430 = dma.done.wait (%p1242_p9), [#allocation6], 4096  }
  0x1e   : > { %1432 = vsyncadd (%p1242_p9), [#allocation6], 4294963200  ;;  %s1005_s15 = sshll.u32 %s1522_s28, 1  ;;  %vm331_vm0 = vcmask 1043456   ;;  %v317_v0 = vld [vmem:[%s1707_s1] sm:$0xf] }
  0x1f   : > { %p308_p13 = scmp.lt.s32.totalorder %s1005_s15, 3  ;;  %v1186_v1 = vld [vmem:[#allocation2 + $0x38] sm:$0xff]  ;;  %v333_v2 = vsel %vm331_vm0, %v317_v0, 0  ;;  %vm327_vm1 = vcmask 64512   ;;  %v1185_v4 = vld [vmem:[#allocation2 + $0x30] sm:$0xff]  ;;  %v1184_v5 = vld [vmem:[#allocation2 + $0x28] sm:$0xff] }
  0x20   : > { %342 = vmatpush.bf16.msra.mxu0 %v333_v2  ;;  %420 = vmatpush.bf16.msra.mxu1 %v1186_v1  ;;  %v1183_v6 = vld [vmem:[#allocation2 + $0x20] sm:$0xff]  ;;  %v1182_v7 = vld [vmem:[#allocation2 + $0x18] sm:$0xff]  ;;  %v1181_v8 = vld [vmem:[#allocation2 + $0x10] sm:$0xff]  ;;  %s304_s14 = sand.u32 1, %s1443_s25   ;;  %s1220_s13 = sshll.u32 %s1522_s28, 5 }
  0x21   : > { %s1722_s15 = smov (!%p308_p13, %s1005_s15), 3  ;;  %v1180_v9 = vld [vmem:[#allocation2 + $0x8] sm:$0xff]  ;;  %v1179_v10 = vld [vmem:[#allocation2] sm:$0xff]  ;;  %v1217_v12 = vld [vmem:[#allocation5 + $0xec] sm:$0xf0]  ;;  %s908_s19 = scalar_lea.hbm %s1713_s7, %s1220_s13 }
  0x22   : > { %s1006_s16 = sshll.u32 %s1722_s15, 2  ;;  %v1158_v11 = vld [vmem:[#allocation5 + $0xe0] sm:$0xf]  ;;  %v1215_v13 = vld [vmem:[#allocation5 + $0xe4] sm:$0xf]  ;;  %s1004_s15 = sshll.u32 %s304_s14, 5 }
  0x23   : > { %s311_s18 = scalar_lea.vmem %s1706_s0, %s1006_s16  ;;  %v1159_v14 = vor.u32 %v1217_v12, %v1158_v11  ;;  %v1160_v15 = vld [vmem:[#allocation5 + $0xf0] sm:$0xf0]  ;;  %v1166_v16 = vld [vmem:[#allocation5 + $0xe8] sm:$0xf]  ;;  %v1218_v17 = vld [vmem:[#allocation5 + $0xf4] sm:$0xf0] }
  0x24   : > { %v1178_v3 = vld [vmem:[%s311_s18] sm:$0xff]  ;;  %421 = vmatpush.bf16.msra.mxu1 %v1185_v4  ;;  %v1163_v18 = vor.u32 %v1215_v13, %v1160_v15  ;;  %v1167_v19 = vor.u32 %v1218_v17, %v1166_v16  ;;  %v1216_v20 = vld [vmem:[#allocation5 + $0xec] sm:$0xf]  ;;  %v1168_v21 = vld [vmem:[#allocation5 + $0xf8] sm:$0xf0]  ;;  %s1628_s16 = scalar_lea.vmem [#allocation7], %s1004_s15 }
  0x25   : > { %1011 = vmatmul.msk.bf16.vlgmr.msra.gmra.mxu0 %vm327_vm1, %v1178_v3  ;;  %v1142_v22 = vld [vmem:[#allocation5 + $0xc0] sm:$0xf]  ;;  %639 = vmatpush.bf16.msra.mxu2 %v1159_v14  ;;  %v1171_v23 = vor.u32 %v1216_v20, %v1168_v21  ;;  %v1213_v24 = vld [vmem:[#allocation5 + $0xcc] sm:$0xf0]  ;;  %v1211_v25 = vld [vmem:[#allocation5 + $0xc4] sm:$0xf] }
  0x26   : > { %v1144_v26 = vld [vmem:[#allocation5 + $0xd0] sm:$0xf0]  ;;  %653 = vmatpush.bf16.msra.mxu3 %v1163_v18  ;;  %667 = vmatpush.bf16.msrb.mxu0 %v1167_v19  ;;  %v1143_v27 = vor.u32 %v1213_v24, %v1142_v22  ;;  %v1150_v29 = vld [vmem:[#allocation5 + $0xc8] sm:$0xf]  ;;  %v1214_v30 = vld [vmem:[#allocation5 + $0xd4] sm:$0xf0] }
  0x27   : > { %v1147_v28 = vor.u32 %v1211_v25, %v1144_v26  ;;  %v1212_v31 = vld [vmem:[#allocation5 + $0xcc] sm:$0xf]  ;;  %v1151_v32 = vor.u32 %v1214_v30, %v1150_v29  ;;  %v1152_v33 = vld [vmem:[#allocation5 + $0xd8] sm:$0xf0]  ;;  %v1126_v34 = vld [vmem:[#allocation5 + $0xa0] sm:$0xf] }
  0x28   : > { %422 = vmatpush.bf16.msra.mxu1 %v1184_v5  ;;  %v1209_v35 = vld [vmem:[#allocation5 + $0xac] sm:$0xf0]  ;;  %v1155_v36 = vor.u32 %v1212_v31, %v1152_v33  ;;  %v1207_v37 = vld [vmem:[#allocation5 + $0xa4] sm:$0xf]  ;;  %v1128_v38 = vld [vmem:[#allocation5 + $0xb0] sm:$0xf0] }
  0x29   : > { %v1134_v39 = vld [vmem:[#allocation5 + $0xa8] sm:$0xf]  ;;  %640 = vmatpush.bf16.msra.mxu2 %v1143_v27  ;;  %v1127_v40 = vor.u32 %v1209_v35, %v1126_v34  ;;  %v1210_v41 = vld [vmem:[#allocation5 + $0xb4] sm:$0xf0]  ;;  %v1208_v42 = vld [vmem:[#allocation5 + $0xac] sm:$0xf]  ;;  %v1131_v44 = vor.u32 %v1207_v37, %v1128_v38 }
  0x2a   : > { %v1136_v43 = vld [vmem:[#allocation5 + $0xb8] sm:$0xf0]  ;;  %654 = vmatpush.bf16.msra.mxu3 %v1147_v28  ;;  %668 = vmatpush.bf16.msrb.mxu0 %v1151_v32  ;;  %v1135_v45 = vor.u32 %v1210_v41, %v1134_v39  ;;  %v1110_v46 = vld [vmem:[#allocation5 + $0x80] sm:$0xf]  ;;  %v1205_v47 = vld [vmem:[#allocation5 + $0x8c] sm:$0xf0] }
  0x2b   : > { %v1203_v48 = vld [vmem:[#allocation5 + $0x84] sm:$0xf]  ;;  %v1139_v49 = vor.u32 %v1208_v42, %v1136_v43  ;;  %v1112_v50 = vld [vmem:[#allocation5 + $0x90] sm:$0xf0]  ;;  %v1118_v51 = vld [vmem:[#allocation5 + $0x88] sm:$0xf]  ;;  %v1111_v55 = vor.u32 %v1205_v47, %v1110_v46 }
  0x2c   : > { %423 = vmatpush.bf16.msra.mxu1 %v1183_v6  ;;  %v1206_v52 = vld [vmem:[#allocation5 + $0x94] sm:$0xf0]  ;;  %v1204_v53 = vld [vmem:[#allocation5 + $0x8c] sm:$0xf]  ;;  %v1120_v54 = vld [vmem:[#allocation5 + $0x98] sm:$0xf0]  ;;  %v1115_v56 = vor.u32 %v1203_v48, %v1112_v50 }
  0x2d   : > { %641 = vmatpush.bf16.msra.mxu2 %v1127_v40  ;;  %v1119_v57 = vor.u32 %v1206_v52, %v1118_v51  ;;  %v1123_v58 = vor.u32 %v1204_v53, %v1120_v54  ;;  %v1287_v60 = vld [vmem:[%s1708_s2] ss:$0 sm:$0xff]  ;;  %v1201_v4 = vld [vmem:[#allocation5 + $0x6c] sm:$0xf0]  ;;  %v1199_v5 = vld [vmem:[#allocation5 + $0x64] sm:$0xf] }
  0x2e   : > { %655 = vmatpush.bf16.msra.mxu3 %v1131_v44  ;;  %669 = vmatpush.bf16.msrb.mxu0 %v1135_v45  ;;  %v1094_v3 = vld [vmem:[#allocation5 + $0x60] sm:$0xf]  ;;  %v1200_v12 = vld [vmem:[#allocation5 + $0x6c] sm:$0xf]  ;;  %v1104_v13 = vld [vmem:[#allocation5 + $0x78] sm:$0xf0] }
  0x2f   : > { %v1095_v6 = vor.u32 %v1201_v4, %v1094_v3  ;;  %v1107_v14 = vor.u32 %v1200_v12, %v1104_v13  ;;  %v1078_v15 = vld [vmem:[#allocation5 + $0x40] sm:$0xf]  ;;  %v1197_v16 = vld [vmem:[#allocation5 + $0x4c] sm:$0xf0]  ;;  %v1195_v17 = vld [vmem:[#allocation5 + $0x44] sm:$0xf] }
  0x30   : > { %424 = vmatpush.bf16.msra.mxu1 %v1182_v7  ;;  %v1096_v7 = vld [vmem:[#allocation5 + $0x70] sm:$0xf0]  ;;  %v1079_v18 = vor.u32 %v1197_v16, %v1078_v15  ;;  %v1086_v20 = vld [vmem:[#allocation5 + $0x48] sm:$0xf]  ;;  %v1198_v21 = vld [vmem:[#allocation5 + $0x54] sm:$0xf0] }
  0x31   : > { %642 = vmatpush.bf16.msra.mxu2 %v1111_v55  ;;  %v1080_v19 = vld [vmem:[#allocation5 + $0x50] sm:$0xf0]  ;;  %v1196_v24 = vld [vmem:[#allocation5 + $0x4c] sm:$0xf]  ;;  %v1088_v25 = vld [vmem:[#allocation5 + $0x58] sm:$0xf0] }
  0x32   : > { %656 = vmatpush.bf16.msra.mxu3 %v1115_v56  ;;  %670 = vmatpush.bf16.msrb.mxu0 %v1119_v57  ;;  %v1083_v22 = vor.u32 %v1195_v17, %v1080_v19  ;;  %v1091_v26 = vor.u32 %v1196_v24, %v1088_v25  ;;  %v1062_v27 = vld [vmem:[#allocation5 + $0x20] sm:$0xf]  ;;  %v1193_v28 = vld [vmem:[#allocation5 + $0x2c] sm:$0xf0]  ;;  %v1191_v29 = vld [vmem:[#allocation5 + $0x24] sm:$0xf] }
  0x33   : > { %v1063_v30 = vor.u32 %v1193_v28, %v1062_v27  ;;  %v1064_v31 = vld [vmem:[#allocation5 + $0x30] sm:$0xf0]  ;;  %v1070_v32 = vld [vmem:[#allocation5 + $0x28] sm:$0xf]  ;;  %v1194_v33 = vld [vmem:[#allocation5 + $0x34] sm:$0xf0] }
  0x34   : > { %425 = vmatpush.bf16.msra.mxu1 %v1181_v8  ;;  %v1102_v8 = vld [vmem:[#allocation5 + $0x68] sm:$0xf]  ;;  %v1067_v34 = vor.u32 %v1191_v29, %v1064_v31  ;;  %v1071_v35 = vor.u32 %v1194_v33, %v1070_v32  ;;  %v1072_v37 = vld [vmem:[#allocation5 + $0x38] sm:$0xf0]  ;;  %v1046_v39 = vld [vmem:[#allocation5] sm:$0xf] }
  0x35   : > { %643 = vmatpush.bf16.msra.mxu2 %v1095_v6  ;;  %v1189_v40 = vld [vmem:[#allocation5 + $0xc] sm:$0xf0]  ;;  %v1187_v41 = vld [vmem:[#allocation5 + $0x4] sm:$0xf]  ;;  %v1048_v43 = vld [vmem:[#allocation5 + $0x10] sm:$0xf0] }
  0x36   : > { %v1047_v42 = vor.u32 %v1189_v40, %v1046_v39  ;;  %v1054_v44 = vld [vmem:[#allocation5 + $0x8] sm:$0xf]  ;;  %v1190_v45 = vld [vmem:[#allocation5 + $0x14] sm:$0xf0]  ;;  %v1051_v46 = vor.u32 %v1187_v41, %v1048_v43  ;;  %v1188_v48 = vld [vmem:[#allocation5 + $0xc] sm:$0xf] }
  0x37   : > { %v1055_v47 = vor.u32 %v1190_v45, %v1054_v44  ;;  %v1288_v52 = vld [vmem:[%s1710_s4] ss:$0 sm:$0xff]  ;;  %s909_s28 = sshll.u32 %s1628_s16, 4  ;;  %s911_s20 = sshll.u32 %s908_s19, 4  ;;  %s910_s28 = int_to_ptr.vmem [resolvable:$true] %s909_s28  ;;  %s912_s20 = int_to_ptr.hbm [resolvable:$true] %s911_s20 }
  0x38   : > { %426 = vmatpush.bf16.msra.mxu1 %v1180_v9  ;;  %v1202_v9 = vld [vmem:[#allocation5 + $0x74] sm:$0xf0]  ;;  %s896_s21 = scalar_lea.sflag [#allocation4], %s304_s14  ;;  %s1395_s22 = sshra.s32 %s912_s20, 4  ;;  %s1396_s22 = int_to_ptr.hbm [resolvable:$true] %s1395_s22 }
  0x39   : > { %v1103_v11 = vor.u32 %v1202_v9, %v1102_v8  ;;  %644 = vmatpush.bf16.msra.mxu2 %v1079_v18  ;;  %s1397_s23 = scalar_lea.hbm %s1396_s22, 32  ;;  %s1401_s9 = scalar_lea.hbm %s1713_s7, 64 }
  0x3a   : > { %p1398_p0 = scmp.ne.s32.totalorder %s1396_s22, %s1397_s23  ;;  %p1402_p3 = scmp.lt.s32.totalorder %s1396_s22, %s1713_s7 }
  0x3b   : > { %671 = vmatpush.bf16.msrb.mxu0 %v1103_v11  ;;  %p1403_p4 = scmp.lt.s32.totalorder %s1401_s9, %s1397_s23 }
  0x3c   : > { %427 = vmatpush.bf16.msra.mxu1 %v1179_v10  ;;  %v1099_v10 = vor.u32 %v1199_v5, %v1096_v7  ;;  %p1399_p1 = pnand %p1398_p0, %p1539_p5 }
  0x3d   : > { %645 = vmatpush.bf16.msra.mxu2 %v1063_v30  ;;  %p1404_p7 = por %p1403_p4, %p1402_p3 }
  0x3e   : > { %657 = vmatpush.bf16.msra.mxu3 %v1099_v10  ;;  %p1400_p2 = pneg %p1399_p1 }
  0x40   : > { %681 = vmatpush.bf16.msrb.mxu1 %v1171_v23  ;;  %v1087_v23 = vor.u32 %v1198_v21, %v1086_v20  ;;  %p1405_p8 = pnand %p1404_p7, %p1400_p2 }
  0x41   : > { %646 = vmatpush.bf16.msra.mxu2 %v1047_v42 }
  0x42   : > { %658 = vmatpush.bf16.msra.mxu3 %v1083_v22  ;;  %672 = vmatpush.bf16.msrb.mxu0 %v1087_v23 }
  0x44   : > { %682 = vmatpush.bf16.msrb.mxu1 %v1155_v36  ;;  %v1192_v36 = vld [vmem:[#allocation5 + $0x2c] sm:$0xf] }
  0x45   : > { %v1075_v38 = vor.u32 %v1192_v36, %v1072_v37 }
  0x46   : > { %659 = vmatpush.bf16.msra.mxu3 %v1067_v34  ;;  %673 = vmatpush.bf16.msrb.mxu0 %v1071_v35 }
  0x48   : > { %683 = vmatpush.bf16.msrb.mxu1 %v1139_v49  ;;  %v1056_v49 = vld [vmem:[#allocation5 + $0x18] sm:$0xf0] }
  0x49   : > { %v1059_v50 = vor.u32 %v1188_v48, %v1056_v49 }
  0x4a   : > { %660 = vmatpush.bf16.msra.mxu3 %v1051_v46  ;;  %674 = vmatpush.bf16.msrb.mxu0 %v1055_v47 }
  0x4c   : > { %684 = vmatpush.bf16.msrb.mxu1 %v1123_v58 }
  0x50   : > { %685 = vmatpush.bf16.msrb.mxu1 %v1107_v14 }
  0x54   : > { %686 = vmatpush.bf16.msrb.mxu1 %v1091_v26 }
  0x58   : > { %687 = vmatpush.bf16.msrb.mxu1 %v1075_v38 }
  0x5c   : > { %688 = vmatpush.bf16.msrb.mxu1 %v1059_v50 }
  0xa2   : > { %v344_v59 = vpop.f32.mrf.mxu0 }
  0xa3   : > { %v345_v61 = vadd.f32 %v1287_v60, %v344_v59  ;;  %v469_v59 = vld [vmem:[%s1712_s6] sm:$0xf] }
  0xa4   : > { %v474_v12 = vperm.slane %v469_v59, 3 }
  0xa5   : > { %v349_v0 = vmax.f32 %v345_v61, 0.0 }
  0xaa   : > { %v346_v62 = vpop.f32.mrf.mxu0 }
  0xab   : > { %v347_v63 = vadd.f32 %v1287_v60, %v346_v62  ;;  %v473_v60 = vperm.slane %v469_v59, 2 }
  0xad   : > { %v350_v1 = vmax.f32 %v347_v63, 0.0  ;;  %v471_v63 = vperm.slane %v469_v59, 0 }
  0xaf   : > { %v351_v2 = vpack.c.bf16 %v350_v1, %v349_v0  ;;  %v472_v0 = vperm.slane %v469_v59, 1 }
  0xb1   : > { %428 = vmatmul.bf16.vlgmr.msra.gmra.mxu1 %v351_v2 }
 0x12e   : > { %v429_v51 = vpop.f32.mrf.mxu1 }
 0x12f   : > { %v430_v53 = vadd.f32 %v1288_v52, %v429_v51 }
 0x131   : > { %v434_v56 = vmax.f32 %v430_v53, 0.0 }
 0x136   : > { %v431_v54 = vpop.f32.mrf.mxu1 }
 0x137   : > { %v432_v55 = vadd.f32 %v1288_v52, %v431_v54 }
 0x139   : > { %v435_v57 = vmax.f32 %v432_v55, 0.0 }
 0x13b   : > { %v436_v58 = vpack.c.bf16 %v435_v57, %v434_v56 }
 0x13d   : > { %647 = vmatmul.bf16.vlgmr.msra.gmra.mxu2 %v436_v58  ;;  %661 = vmatmul.bf16.vlgmr.msra.gmra.mxu3 %v436_v58 }
 0x13e   : > { %675 = vmatmul.bf16.vlgmr.msrb.gmra.mxu0 %v436_v58  ;;  %689 = vmatmul.bf16.vlgmr.msrb.gmra.mxu1 %v436_v58 }
 0x1bb   : > { %v676_v61 = vpop.f32.mrf.mxu0  ;;  %v690_v6 = vpop.f32.mrf.mxu1 }
 0x1bc   : > { %v677_v62 = vadd.f32 %v676_v61, %v473_v60  ;;  %v691_v14 = vadd.f32 %v690_v6, %v474_v12 }
 0x1be   : > { %795 = vmax.xlane.f32.xlu2 %v677_v62 }
 0x1c0   : > { %v648_v1 = vpop.f32.mrf.mxu2  ;;  %v662_v2 = vpop.f32.mrf.mxu3 }
 0x1c1   : > { %v649_v3 = vadd.f32 %v648_v1, %v471_v63  ;;  %v663_v4 = vadd.f32 %v662_v2, %v472_v0 }
 0x1c3   : > { %v678_v5 = vpop.f32.mrf.mxu0  ;;  %745 = vmax.xlane.f32.xlu1 %v663_v4  ;;  %695 = vmax.xlane.f32.xlu0 %v649_v3  ;;  %v692_v13 = vpop.f32.mrf.mxu1 }
 0x1c4   : > { %v679_v7 = vadd.f32 %v678_v5, %v473_v60  ;;  %v693_v15 = vadd.f32 %v692_v13, %v474_v12 }
 0x1c6   : > { %797 = vmax.xlane.f32.xlu2 %v679_v7 }
 0x1c8   : > { %v650_v8 = vpop.f32.mrf.mxu2  ;;  %v664_v9 = vpop.f32.mrf.mxu3 }
 0x1c9   : > { %v651_v10 = vadd.f32 %v650_v8, %v471_v63  ;;  %v665_v11 = vadd.f32 %v664_v9, %v472_v0 }
 0x1cb   : > { %747 = vmax.xlane.f32.xlu1 %v665_v11  ;;  %697 = vmax.xlane.f32.xlu0 %v651_v10 }
 0x1d3   : > { %847 = vmax.xlane.f32.xlu1 %v693_v15  ;;  %845 = vmax.xlane.f32.xlu0 %v691_v14 }
 0x231   : > { %v796_v16 = vpop.xlane.xlu2 %795 }
 0x232   : > { %v799_v17 = vsub.f32 %v677_v62, %v796_v16 }
 0x234   : > { %v801_v18 = vmul.f32 1.442695, %v799_v17 }
 0x236   : > { %1289 = vpow2.f32 %v801_v18  ;;  %v746_v19 = vpop.xlane.xlu1 %745  ;;  %v696_v20 = vpop.xlane.xlu0 %695 }
 0x237   : > { %v749_v21 = vsub.f32 %v663_v4, %v746_v19  ;;  %v699_v22 = vsub.f32 %v649_v3, %v696_v20 }
 0x239   : > { %v751_v23 = vmul.f32 1.442695, %v749_v21  ;;  %v701_v24 = vmul.f32 1.442695, %v699_v22  ;;  %v798_v25 = vpop.xlane.xlu2 %797 }
 0x23a   : > { %v800_v26 = vsub.f32 %v679_v7, %v798_v25 }
 0x23b   : > { %1291 = vpow2.f32 %v751_v23 }
 0x23c   : > { %v1590_v27 = vpop.eup %1289  ;;  %1293 = vpow2.f32 %v701_v24  ;;  %v803_v28 = vmul.f32 1.442695, %v800_v26 }
 0x23d   : > { %805 = vadd.xlane.f32.xlu0 %v1590_v27 }
 0x23e   : > { %v748_v29 = vpop.xlane.xlu1 %747  ;;  %v698_v30 = vpop.xlane.xlu0 %697  ;;  %1295 = vpow2.f32 %v803_v28 }
 0x23f   : > { %v750_v31 = vsub.f32 %v665_v11, %v748_v29  ;;  %v700_v32 = vsub.f32 %v651_v10, %v698_v30 }
 0x241   : > { %v1593_v33 = vpop.eup %1291  ;;  %v753_v34 = vmul.f32 1.442695, %v750_v31  ;;  %v703_v35 = vmul.f32 1.442695, %v700_v32 }
 0x242   : > { %v1595_v36 = vpop.eup %1293  ;;  %755 = vadd.xlane.f32.xlu1 %v1593_v33 }
 0x243   : > { %1297 = vpow2.f32 %v753_v34  ;;  %705 = vadd.xlane.f32.xlu2 %v1595_v36 }
 0x244   : > { %1299 = vpow2.f32 %v703_v35  ;;  %v1599_v41 = vpop.eup %1295 }
 0x246   : > { %v848_v37 = vpop.xlane.xlu1 %847  ;;  %v846_v38 = vpop.xlane.xlu0 %845 }
 0x247   : > { %v850_v39 = vsub.f32 %v693_v15, %v848_v37  ;;  %v849_v40 = vsub.f32 %v691_v14, %v846_v38 }
 0x249   : > { %v1601_v42 = vpop.eup %1297  ;;  %v853_v43 = vmul.f32 1.442695, %v850_v39  ;;  %v851_v44 = vmul.f32 1.442695, %v849_v40 }
 0x24a   : > { %v1603_v45 = vpop.eup %1299  ;;  %807 = vadd.xlane.f32.xlu1 %v1599_v41 }
 0x24b   : > { %1301 = vpow2.f32 %v853_v43  ;;  %757 = vadd.xlane.f32.xlu2 %v1601_v42  ;;  %707 = vadd.xlane.f32.xlu0 %v1603_v45 }
 0x24c   : > { %1303 = vpow2.f32 %v851_v44 }
 0x251   : > { %v1608_v46 = vpop.eup %1301 }
 0x252   : > { %v1610_v47 = vpop.eup %1303 }
 0x253   : > { %857 = vadd.xlane.f32.xlu0 %v1608_v46  ;;  %855 = vadd.xlane.f32.xlu2 %v1610_v47 }
 0x2b0   : > { %v806_v48 = vpop.xlane.xlu0 %805 }
 0x2b1   : > { %1305 = vrcp.f32 %v806_v48  ;;  %v818_v54 = vand.u32 2147483647, %v806_v48  ;;  %v820_v55 = vand.u32 2147483648, %v806_v48  ;;  %vm814_vm3 = vweird.f32 %v806_v48 }
 0x2b3   : > { %vm819_vm5 = vcmp.eq.f32.partialorder %v818_v54, 8.507059e+37  ;;  %v821_v1 = vor.u32 1.1754944e-38, %v820_v55 }
 0x2b5   : > { %v756_v49 = vpop.xlane.xlu1 %755 }
 0x2b6   : > { %1307 = vrcp.f32 %v756_v49  ;;  %v706_v50 = vpop.xlane.xlu2 %705  ;;  %v768_v3 = vand.u32 2147483647, %v756_v49  ;;  %v770_v5 = vand.u32 2147483648, %v756_v49  ;;  %vm764_vm8 = vweird.f32 %v756_v49 }
 0x2b7   : > { %v1306_v51 = vpop.eup %1305  ;;  %1309 = vrcp.f32 %v706_v50  ;;  %v720_v9 = vand.u32 2147483648, %v706_v50  ;;  %v718_v12 = vand.u32 2147483647, %v706_v50  ;;  %vm714_vm10 = vweird.f32 %v706_v50 }
 0x2b8   : > { %v810_v52 = vmul.f32 %v1306_v51, %v806_v48  ;;  %vm815_vm2 = vweird.f32 %v1306_v51  ;;  %v771_v16 = vor.u32 1.1754944e-38, %v770_v5  ;;  %vm769_vm11 = vcmp.eq.f32.partialorder %v768_v3, 8.507059e+37 }
 0x2b9   : > { %vm816_vm4 = vmor %vm814_vm3, %vm815_vm2  ;;  %v721_v19 = vor.u32 1.1754944e-38, %v720_v9  ;;  %vm719_vm13 = vcmp.eq.f32.partialorder %v718_v12, 8.507059e+37 }
 0x2ba   : > { %v811_v53 = vsub.f32 1.0, %v810_v52 }
 0x2bc   : > { %v1308_v56 = vpop.eup %1307  ;;  %v812_v57 = vmul.f32 %v1306_v51, %v811_v53 }
 0x2bd   : > { %v1310_v58 = vpop.eup %1309  ;;  %v760_v59 = vmul.f32 %v1308_v56, %v756_v49  ;;  %v1615_v60 = vpop.xlane.xlu1 %807  ;;  %vm765_vm6 = vweird.f32 %v1308_v56 }
 0x2be   : > { %v813_v61 = vadd.f32 %v1306_v51, %v812_v57  ;;  %v710_v62 = vmul.f32 %v1310_v58, %v706_v50  ;;  %1311 = vrcp.f32 %v1615_v60  ;;  %v1618_v63 = vpop.xlane.xlu2 %757  ;;  %v1620_v0 = vpop.xlane.xlu0 %707  ;;  %vm715_vm7 = vweird.f32 %v1310_v58  ;;  %vm766_vm9 = vmor %vm764_vm8, %vm765_vm6 }
 0x2bf   : > { %v761_v2 = vsub.f32 1.0, %v760_v59  ;;  %1313 = vrcp.f32 %v1618_v63  ;;  %vm716_vm12 = vmor %vm714_vm10, %vm715_vm7  ;;  %vm829_vm14 = vweird.f32 %v1615_v60  ;;  %v833_v30 = vand.u32 2147483647, %v1615_v60 }
 0x2c0   : > { %v817_v4 = vsel %vm816_vm4, %v1306_v51, %v813_v61  ;;  %v711_v6 = vsub.f32 1.0, %v710_v62  ;;  %1315 = vrcp.f32 %v1620_v0  ;;  %v835_v31 = vand.u32 2147483648, %v1615_v60 }
 0x2c1   : > { %v822_v7 = vsel %vm819_vm5, %v821_v1, %v817_v4  ;;  %v762_v8 = vmul.f32 %v1308_v56, %v761_v2  ;;  %v783_v39 = vand.u32 2147483647, %v1618_v63  ;;  %v785_v40 = vand.u32 2147483648, %v1618_v63 }
 0x2c2   : > { %v839_v10 = vmul.f32 %v1590_v27, %v822_v7  ;;  %v712_v11 = vmul.f32 %v1310_v58, %v711_v6  ;;  %v836_v48 = vor.u32 1.1754944e-38, %v835_v31  ;;  %vm779_vm2 = vweird.f32 %v1618_v63 }
 0x2c3   : > { %v763_v13 = vadd.f32 %v1308_v56, %v762_v8  ;;  %v733_v50 = vand.u32 2147483647, %v1620_v0  ;;  %vm834_vm3 = vcmp.eq.f32.partialorder %v833_v30, 8.507059e+37  ;;  %v735_v53 = vand.u32 2147483648, %v1620_v0 }
 0x2c4   : > { %v1312_v14 = vpop.eup %1311  ;;  %v841_v15 = vpack.c.bf16 %v839_v10, %v839_v10  ;;  %v713_v17 = vadd.f32 %v1310_v58, %v712_v11  ;;  %vm784_vm6 = vcmp.eq.f32.partialorder %v783_v39, 8.507059e+37  ;;  %vm729_vm7 = vweird.f32 %v1620_v0 }
 0x2c5   : > { %v767_v18 = vsel %vm766_vm9, %v1308_v56, %v763_v13  ;;  %v825_v20 = vmul.f32 %v1312_v14, %v1615_v60  ;;  %v1314_v21 = vpop.eup %1313  ;;  %vm830_vm15 = vweird.f32 %v1312_v14  ;;  %v786_v56 = vor.u32 1.1754944e-38, %v785_v40 }
 0x2c6   : > { %843 = vst [vmem:[%s1628_s16 + $0x8] sm:$0xf] %v841_v15  ;;  %v772_v22 = vsel %vm769_vm11, %v771_v16, %v767_v18  ;;  %v717_v23 = vsel %vm716_vm12, %v1310_v58, %v713_v17  ;;  %v1632_v24 = vpop.xlane.xlu2 %855  ;;  %v775_v28 = vmul.f32 %v1314_v21, %v1618_v63  ;;  %v1640_v32 = vpop.xlane.xlu0 %857  ;;  %vm780_vm0 = vweird.f32 %v1314_v21  ;;  %vm831_vm1 = vmor %vm829_vm14, %vm830_vm15 }
 0x2c7   : > { %v789_v25 = vmul.f32 %v1593_v33, %v772_v22  ;;  %v722_v26 = vsel %vm719_vm13, %v721_v19, %v717_v23  ;;  %v826_v27 = vsub.f32 1.0, %v825_v20  ;;  %1317 = vrcp.f32 %v1632_v24  ;;  %v1316_v34 = vpop.eup %1315  ;;  %vm781_vm4 = vmor %vm779_vm2, %vm780_vm0 }
 0x2c8   : > { %v739_v29 = vmul.f32 %v1595_v36, %v722_v26  ;;  %v776_v33 = vsub.f32 1.0, %v775_v28  ;;  %v725_v36 = vmul.f32 %v1316_v34, %v1620_v0  ;;  %1319 = vrcp.f32 %v1640_v32 }
 0x2c9   : > { %v791_v35 = vpack.c.bf16 %v789_v25, %v789_v25  ;;  %v827_v37 = vmul.f32 %v1312_v14, %v826_v27  ;;  %vm730_vm5 = vweird.f32 %v1316_v34  ;;  %vm734_vm8 = vcmp.eq.f32.partialorder %v733_v50, 8.507059e+37 }
 0x2ca   : > { %v741_v38 = vpack.c.bf16 %v739_v29, %v739_v29  ;;  %v777_v44 = vmul.f32 %v1314_v21, %v776_v33  ;;  %v726_v49 = vsub.f32 1.0, %v725_v36  ;;  %vm731_vm9 = vmor %vm729_vm7, %vm730_vm5  ;;  %v736_v3 = vor.u32 1.1754944e-38, %v735_v53 }
 0x2cb   : > { %793 = vst [vmem:[%s1628_s16 + $0x4] sm:$0xf] %v791_v35  ;;  %v828_v43 = vadd.f32 %v1312_v14, %v827_v37  ;;  %v870_v6 = vand.u32 2147483648, %v1632_v24  ;;  %vm864_vm11 = vweird.f32 %v1632_v24  ;;  %v883_v12 = vand.u32 2147483647, %v1640_v32 }
 0x2cc   : > { %743 = vst [vmem:[%s1628_s16] sm:$0xf] %v741_v38  ;;  %v778_v52 = vadd.f32 %v1314_v21, %v777_v44  ;;  %v727_v57 = vmul.f32 %v1316_v34, %v726_v49  ;;  %v885_v13 = vand.u32 2147483648, %v1640_v32  ;;  %vm879_vm15 = vweird.f32 %v1640_v32 }
 0x2cd   : > { %v832_v51 = vsel %vm831_vm1, %v1312_v14, %v828_v43  ;;  %v1318_v54 = vpop.eup %1317  ;;  %v871_v15 = vor.u32 1.1754944e-38, %v870_v6  ;;  %vm884_vm1 = vcmp.eq.f32.partialorder %v883_v12, 8.507059e+37 }
 0x2ce   : > { %v837_v55 = vsel %vm834_vm3, %v836_v48, %v832_v51  ;;  %v782_v59 = vsel %vm781_vm4, %v1314_v21, %v778_v52  ;;  %v860_v60 = vmul.f32 %v1318_v54, %v1632_v24  ;;  %v728_v62 = vadd.f32 %v1316_v34, %v727_v57  ;;  %v1320_v63 = vpop.eup %1319 }
 0x2cf   : > { %v840_v58 = vmul.f32 %v1599_v41, %v837_v55  ;;  %v787_v61 = vsel %vm784_vm6, %v786_v56, %v782_v59  ;;  %v868_v41 = vand.u32 2147483647, %v1632_v24  ;;  %v875_v7 = vmul.f32 %v1320_v63, %v1640_v32 }
 0x2d0   : > { %v790_v2 = vmul.f32 %v1601_v42, %v787_v61  ;;  %v861_v4 = vsub.f32 1.0, %v860_v60  ;;  %v732_v5 = vsel %vm731_vm9, %v1316_v34, %v728_v62  ;;  %vm865_vm10 = vweird.f32 %v1318_v54 }
 0x2d1   : > { %v842_v1 = vpack.c.bf16 %v840_v58, %v840_v58  ;;  %v737_v0 = vsel %vm734_vm8, %v736_v3, %v732_v5  ;;  %v876_v42 = vsub.f32 1.0, %v875_v7  ;;  %vm866_vm12 = vmor %vm864_vm11, %vm865_vm10  ;;  %vm880_vm13 = vweird.f32 %v1320_v63 }
 0x2d2   : > { %v792_v8 = vpack.c.bf16 %v790_v2, %v790_v2  ;;  %v862_v9 = vmul.f32 %v1318_v54, %v861_v4  ;;  %v740_v10 = vmul.f32 %v1603_v45, %v737_v0  ;;  %vm869_vm14 = vcmp.eq.f32.partialorder %v868_v41, 8.507059e+37  ;;  %vm881_vm0 = vmor %vm879_vm15, %vm880_vm13 }
 0x2d3   : > { %844 = vst [vmem:[%s1628_s16 + $0x18] sm:$0xf] %v842_v1  ;;  %v877_v16 = vmul.f32 %v1320_v63, %v876_v42  ;;  %v886_v20 = vor.u32 1.1754944e-38, %v885_v13 }
 0x2d4   : > { %794 = vst [vmem:[%s1628_s16 + $0x14] sm:$0xf] %v792_v8  ;;  %v863_v11 = vadd.f32 %v1318_v54, %v862_v9  ;;  %v742_v14 = vpack.c.bf16 %v740_v10, %v740_v10 }
 0x2d5   : > { %v878_v18 = vadd.f32 %v1320_v63, %v877_v16 }
 0x2d6   : > { %v867_v17 = vsel %vm866_vm12, %v1318_v54, %v863_v11  ;;  %744 = vst [vmem:[%s1628_s16 + $0x10] sm:$0xf] %v742_v14 }
 0x2d7   : > { %v872_v45 = vsel %vm869_vm14, %v871_v15, %v867_v17  ;;  %v882_v21 = vsel %vm881_vm0, %v1320_v63, %v878_v18 }
 0x2d8   : > { %v889_v19 = vmul.f32 %v1610_v47, %v872_v45  ;;  %v887_v23 = vsel %vm884_vm1, %v886_v20, %v882_v21 }
 0x2d9   : > { %v890_v24 = vmul.f32 %v1608_v46, %v887_v23 }
 0x2da   : > { %v891_v22 = vpack.c.bf16 %v889_v19, %v889_v19 }
 0x2db   : > { %v892_v25 = vpack.c.bf16 %v890_v24, %v890_v24 }
 0x2dc   : > { %893 = vst [vmem:[%s1628_s16 + $0xc] sm:$0xf] %v891_v22 }
 0x2dd   : > { %894 = vst [vmem:[%s1628_s16 + $0x1c] sm:$0xf] %v892_v25 }
 0x2de   : > { %1408 = shalt.err (!%p1405_p8)
}
 0x2df   : > { %s1459_s14 = smov 256   ;;  %s1460_s16 = smov 16  }
 0x2e0   : > { %1229 = dma.vmem_to_hbm [thread:$0]  (%p1539_p5), %s910_s28, 512, %s912_s20, %s896_s21, %s1459_s14, %s1459_s14, %s1460_s16  }
 0x2e1 PF: > { %p1246_p9 = scmp.ge.s32.totalorder %s1451_s27, 2  ;;  %s926_s17 = sand.u32 1, %s1439_s24  }
 0x2e2   : > { %s927_s18 = scalar_lea.sflag [#allocation4], %s926_s17 }
 0x2e3   : > { %p1239_p10 = pnand %p1246_p9, %p1543_p6 }
 0x2e5   : > { %p1240_p11 = pneg %p1239_p10 }
 0x2e7   : > { %1434 = dma.done.wait (%p1240_p11), %s927_s18, 512  }
 0x2e8   : > { %1436 = vsyncadd (%p1240_p11), %s927_s18, 4294966784  ;;  %p19_p12 = scmp.ge.s32.totalorder %s1526_s30, 4   ;;  %s1717_s24 = smov %s1443_s25 }
 0x2e9   : > { %s1718_s25 = smov %s1447_s26  ;;  %s1719_s26 = smov %s1537_s10 }
 0x2ea   : > { %s1720_s27 = smov %s1526_s30  ;;  %21 = sbr.rel (!%p19_p12) target bundleno = 5 (0x5), region = 92 }
 0x2ef   :  { %933 = vsyncpa [#allocation3], 1 }
 0x2f0   :  { %935 = vsyncpa [#allocation3 + $0x1], 1 }
 0x2f1   :  { %936 = vsyncpa [#allocation6], 1 }
 0x2f2   :  { %937 = vsyncpa [#allocation4], 1 }
 0x2f3   :  { %939 = vsyncpa [#allocation4 + $0x1], 1 }

</bundles_post_ra>
